<compile_context>
chip_gen: v5e
topology: v5e:2x2
jax: 0.10.0
libtpu: 0.0.40
codegen_flags: <defaults>
</compile_context>

<pallas_src>
import jax
import jax.numpy as jnp
from jax import lax
from jax.experimental import pallas as pl
from jax.experimental.pallas import tpu as pltpu


DROPOUT_P = 0.3
BN_EPS = 1e-5
LANE = 128


def _round_up(n, m):
    return ((n + m - 1) // m) * m


def _batchnorm_train(h, gamma, beta, inv_b):
    # One-pass batch statistics (biased var, matching torch training-mode
    # normalization), fused into a per-feature scale/shift so only two
    # full-slab VPU ops touch the (B, hidden) activation.
    s1 = jnp.sum(h, axis=0, keepdims=True)
    s2 = jnp.sum(h * h, axis=0, keepdims=True)
    mean = s1 * inv_b
    var = jnp.maximum(s2 * inv_b - mean * mean, 0.0)   # clamp f32 cancellation
    scale = gamma * lax.rsqrt(var + BN_EPS)
    shift = beta - mean * scale
    return h * scale + shift


def classifier_kernel(
    x_ref,                       # (B, Kp)      f32, zero-padded input
    m1_ref, m2_ref,              # (B, Hp)      f32 dropout masks in {0, 1/(1-p)}
    w1_ref, g1_ref, be1_ref,     # fc1 weight (bf16) + bn1 affine (f32)
    wh_ref, g2_ref, be2_ref,     # fch weight (bf16) + bn2 affine (f32)
    w2_ref, b2_ref,              # fc2 weight (bf16) + bias (f32, pads = -1e30)
    o_ref,                       # (B, Op)      f32 lane-dense softmax output
):
    batch = x_ref.shape[0]
    inv_b = jnp.float32(1.0 / batch)

    # --- fc1 -> bn1 -> relu (+) dropout ---
    x = x_ref[...].astype(jnp.bfloat16)
    h = jnp.dot(x, w1_ref[...], preferred_element_type=jnp.float32)
    h = _batchnorm_train(h, g1_ref[...], be1_ref[...], inv_b)
    h = jnp.maximum(h, 0.0) * m1_ref[...]

    # --- fch -> bn2 -> relu (+) dropout ---
    h = jnp.dot(h.astype(jnp.bfloat16), wh_ref[...],
                preferred_element_type=jnp.float32)
    h = _batchnorm_train(h, g2_ref[...], be2_ref[...], inv_b)
    h = jnp.maximum(h, 0.0) * m2_ref[...]

    # --- fc2 -> softmax(dim=1); padded columns carry bias -1e30 -> prob ~0 ---
    logits = jnp.dot(h.astype(jnp.bfloat16), w2_ref[...],
                     preferred_element_type=jnp.float32) + b2_ref[...]
    m = jnp.max(logits, axis=1, keepdims=True)
    e = jnp.exp(logits - m)
    o_ref[...] = e / jnp.sum(e, axis=1, keepdims=True)


def prepare_params(params):
    """One-time padding + bf16 cast of the weights (hoisted out of the forward path)."""
    (w1, b1, g1, be1, wh, bh, g2, be2, w2, b2) = params
    del b1, bh  # per-feature constants before training-mode BN cancel exactly

    in_dim, hidden = w1.shape
    out_dim = w2.shape[1]
    kp = _round_up(in_dim, LANE)
    hp = _round_up(hidden, LANE)
    op = _round_up(out_dim, LANE)

    prepared = dict(
        in_dim=in_dim, hidden=hidden, out_dim=out_dim, kp=kp, hp=hp, op=op,
        w1=jnp.pad(w1, ((0, kp - in_dim), (0, hp - hidden))).astype(jnp.bfloat16),
        g1=jnp.pad(g1, ((0, 0), (0, hp - hidden)), constant_values=1.0),
        be1=jnp.pad(be1, ((0, 0), (0, hp - hidden))),
        wh=jnp.pad(wh, ((0, hp - hidden), (0, hp - hidden))).astype(jnp.bfloat16),
        g2=jnp.pad(g2, ((0, 0), (0, hp - hidden)), constant_values=1.0),
        be2=jnp.pad(be2, ((0, 0), (0, hp - hidden))),
        w2=jnp.pad(w2, ((0, hp - hidden), (0, op - out_dim))).astype(jnp.bfloat16),
        b2=jnp.pad(b2, ((0, 0), (0, op - out_dim)), constant_values=-1e30),
    )
    return prepared


def classifier_forward(x, prepared, dropout_key):
    """x: (B, input_dim) float32. Returns softmax probabilities (B, output_dim)."""
    batch, in_dim = x.shape
    assert in_dim == prepared["in_dim"]
    kp, hp, op = prepared["kp"], prepared["hp"], prepared["op"]
    out_dim = prepared["out_dim"]

    # Lane-dense input (single cheap pad per call).
    xp = jnp.pad(x, ((0, 0), (0, kp - in_dim)))

    # Inverted-dropout masks, scale folded in: values {0, 1/(1-p)}.
    keep = 1.0 - DROPOUT_P
    k1, k2 = jax.random.split(dropout_key)
    m1 = jax.random.bernoulli(k1, keep, (batch, hp)).astype(jnp.float32) * (1.0 / keep)
    m2 = jax.random.bernoulli(k2, keep, (batch, hp)).astype(jnp.float32) * (1.0 / keep)

    vmem = pl.BlockSpec(memory_space=pltpu.MemorySpace.VMEM)

    out_padded = pl.pallas_call(
        classifier_kernel,
        out_shape=jax.ShapeDtypeStruct((batch, op), jnp.float32),
        in_specs=[vmem] * 11,
        out_specs=vmem,
        compiler_params=pltpu.CompilerParams(vmem_limit_bytes=32 * 1024 * 1024),
    )(xp, m1, m2,
      prepared["w1"], prepared["g1"], prepared["be1"],
      prepared["wh"], prepared["g2"], prepared["be2"],
      prepared["w2"], prepared["b2"])

    return out_padded[:, :out_dim]


def init_params(key, input_dim, hidden_dim, output_dim):
    """Deterministic parameter init mirroring the module's __init__ shapes.
    fch.weight is initialized to the identity (torch.nn.init.eye_)."""
    ks = jax.random.split(key, 3)

    def linear(k, fan_in, fan_out):
        kw, kb = jax.random.split(k)
        bound = 1.0 / jnp.sqrt(jnp.float32(fan_in))
        w = jax.random.uniform(kw, (fan_in, fan_out), jnp.float32, -bound, bound)
        b = jax.random.uniform(kb, (1, fan_out), jnp.float32, -bound, bound)
        return w, b

    w1, b1 = linear(ks[0], input_dim, hidden_dim)
    _, bh = linear(ks[1], hidden_dim, hidden_dim)
    wh = jnp.eye(hidden_dim, dtype=jnp.float32)          # torch.nn.init.eye_
    w2, b2 = linear(ks[2], hidden_dim, output_dim)

    # BatchNorm affine params (default init: gamma=1, beta=0)
    g1 = jnp.ones((1, hidden_dim), jnp.float32)
    be1 = jnp.zeros((1, hidden_dim), jnp.float32)
    g2 = jnp.ones((1, hidden_dim), jnp.float32)
    be2 = jnp.zeros((1, hidden_dim), jnp.float32)

    return (w1, b1, g1, be1, wh, bh, g2, be2, w2, b2)


if __name__ == "__main__":
    batch, input_dim, hidden_dim, output_dim = 8, 32, 128, 8

    key = jax.random.PRNGKey(0)
    kx, kp, kd = jax.random.split(key, 3)
    x = jax.random.normal(kx, (batch, input_dim), jnp.float32)
    params = init_params(kp, input_dim, hidden_dim, output_dim)
    prepared = prepare_params(params)

    probs = classifier_forward(x, prepared, dropout_key=kd)
    probs = jax.block_until_ready(probs)

    # sanity: rows are valid probability distributions
    assert probs.shape == (batch, output_dim)
    assert bool(jnp.all(jnp.isfinite(probs)))
    assert bool(jnp.all(probs >= 0.0))
    assert bool(jnp.allclose(jnp.sum(probs, axis=1), 1.0, atol=1e-3))

    print("KERNEL_OK")
</pallas_src>

<mosaic_0001>
module attributes {stable_mosaic.version = 11 : i64} {
  func.func @classifier_kernel(%arg0: memref<8x128xf32, #tpu.memory_space<vmem>>, %arg1: memref<8x128xf32, #tpu.memory_space<vmem>>, %arg2: memref<8x128xf32, #tpu.memory_space<vmem>>, %arg3: memref<128x128xbf16, #tpu.memory_space<vmem>>, %arg4: memref<1x128xf32, #tpu.memory_space<vmem>>, %arg5: memref<1x128xf32, #tpu.memory_space<vmem>>, %arg6: memref<128x128xbf16, #tpu.memory_space<vmem>>, %arg7: memref<1x128xf32, #tpu.memory_space<vmem>>, %arg8: memref<1x128xf32, #tpu.memory_space<vmem>>, %arg9: memref<128x128xbf16, #tpu.memory_space<vmem>>, %arg10: memref<1x128xf32, #tpu.memory_space<vmem>>, %arg11: memref<8x128xf32, #tpu.memory_space<vmem>>) attributes {dimension_semantics = [], scalar_prefetch = 0 : i64, scratch_operands = 0 : i64, tpu.core_type = #tpu.core_type<tc>} {
    %c0 = arith.constant 0 : index
    %c0_0 = arith.constant 0 : index
    %0 = vector.load %arg0[%c0, %c0_0] : memref<8x128xf32, #tpu.memory_space<vmem>>, vector<8x128xf32>
    %1 = arith.truncf %0 : vector<8x128xf32> to vector<8x128xbf16>
    %c0_1 = arith.constant 0 : index
    %c0_2 = arith.constant 0 : index
    %2 = vector.load %arg3[%c0_1, %c0_2] : memref<128x128xbf16, #tpu.memory_space<vmem>>, vector<128x128xbf16>
    %cst = arith.constant dense<0.000000e+00> : vector<8x128xf32>
    %3 = tpu.matmul %1, %2, %cst {dimension_numbers = #tpu.dot_dimension_numbers<[1], [0], [0], [1], [0, 0, 1, 1], [], []>} : vector<8x128xbf16>, vector<128x128xbf16>, vector<8x128xf32> -> vector<8x128xf32>
    %c0_3 = arith.constant 0 : index
    %c0_4 = arith.constant 0 : index
    %4 = vector.load %arg4[%c0_3, %c0_4] : memref<1x128xf32, #tpu.memory_space<vmem>>, vector<1x128xf32>
    %c0_5 = arith.constant 0 : index
    %c0_6 = arith.constant 0 : index
    %5 = vector.load %arg5[%c0_5, %c0_6] : memref<1x128xf32, #tpu.memory_space<vmem>>, vector<1x128xf32>
    %cst_7 = arith.constant dense<0.000000e+00> : vector<128xf32>
    %6 = vector.multi_reduction <add>, %3, %cst_7 [0] : vector<8x128xf32> to vector<128xf32>
    %7 = vector.shape_cast %6 : vector<128xf32> to vector<1x128xf32>
    %8 = arith.mulf %3, %3 : vector<8x128xf32>
    %cst_8 = arith.constant dense<0.000000e+00> : vector<128xf32>
    %9 = vector.multi_reduction <add>, %8, %cst_8 [0] : vector<8x128xf32> to vector<128xf32>
    %10 = vector.shape_cast %9 : vector<128xf32> to vector<1x128xf32>
    %cst_9 = arith.constant 1.250000e-01 : f32
    %11 = vector.broadcast %cst_9 : f32 to vector<1x128xf32>
    %12 = arith.mulf %7, %11 : vector<1x128xf32>
    %cst_10 = arith.constant 1.250000e-01 : f32
    %13 = vector.broadcast %cst_10 : f32 to vector<1x128xf32>
    %14 = arith.mulf %10, %13 : vector<1x128xf32>
    %15 = arith.mulf %12, %12 : vector<1x128xf32>
    %16 = arith.subf %14, %15 : vector<1x128xf32>
    %cst_11 = arith.constant 0.000000e+00 : f32
    %17 = vector.broadcast %cst_11 : f32 to vector<1x128xf32>
    %18 = arith.maximumf %16, %17 : vector<1x128xf32>
    %cst_12 = arith.constant 9.99999974E-6 : f32
    %19 = vector.broadcast %cst_12 : f32 to vector<1x128xf32>
    %20 = arith.addf %18, %19 : vector<1x128xf32>
    %21 = math.rsqrt %20 : vector<1x128xf32>
    %22 = arith.mulf %4, %21 : vector<1x128xf32>
    %23 = arith.mulf %12, %22 : vector<1x128xf32>
    %24 = arith.subf %5, %23 : vector<1x128xf32>
    %25 = vector.broadcast %22 : vector<1x128xf32> to vector<8x128xf32>
    %26 = arith.mulf %3, %25 : vector<8x128xf32>
    %27 = vector.broadcast %24 : vector<1x128xf32> to vector<8x128xf32>
    %28 = arith.addf %26, %27 : vector<8x128xf32>
    %cst_13 = arith.constant 0.000000e+00 : f32
    %29 = vector.broadcast %cst_13 : f32 to vector<8x128xf32>
    %30 = arith.maximumf %28, %29 : vector<8x128xf32>
    %c0_14 = arith.constant 0 : index
    %c0_15 = arith.constant 0 : index
    %31 = vector.load %arg1[%c0_14, %c0_15] : memref<8x128xf32, #tpu.memory_space<vmem>>, vector<8x128xf32>
    %32 = arith.mulf %30, %31 : vector<8x128xf32>
    %33 = arith.truncf %32 : vector<8x128xf32> to vector<8x128xbf16>
    %c0_16 = arith.constant 0 : index
    %c0_17 = arith.constant 0 : index
    %34 = vector.load %arg6[%c0_16, %c0_17] : memref<128x128xbf16, #tpu.memory_space<vmem>>, vector<128x128xbf16>
    %cst_18 = arith.constant dense<0.000000e+00> : vector<8x128xf32>
    %35 = tpu.matmul %33, %34, %cst_18 {dimension_numbers = #tpu.dot_dimension_numbers<[1], [0], [0], [1], [0, 0, 1, 1], [], []>} : vector<8x128xbf16>, vector<128x128xbf16>, vector<8x128xf32> -> vector<8x128xf32>
    %c0_19 = arith.constant 0 : index
    %c0_20 = arith.constant 0 : index
    %36 = vector.load %arg7[%c0_19, %c0_20] : memref<1x128xf32, #tpu.memory_space<vmem>>, vector<1x128xf32>
    %c0_21 = arith.constant 0 : index
    %c0_22 = arith.constant 0 : index
    %37 = vector.load %arg8[%c0_21, %c0_22] : memref<1x128xf32, #tpu.memory_space<vmem>>, vector<1x128xf32>
    %cst_23 = arith.constant dense<0.000000e+00> : vector<128xf32>
    %38 = vector.multi_reduction <add>, %35, %cst_23 [0] : vector<8x128xf32> to vector<128xf32>
    %39 = vector.shape_cast %38 : vector<128xf32> to vector<1x128xf32>
    %40 = arith.mulf %35, %35 : vector<8x128xf32>
    %cst_24 = arith.constant dense<0.000000e+00> : vector<128xf32>
    %41 = vector.multi_reduction <add>, %40, %cst_24 [0] : vector<8x128xf32> to vector<128xf32>
    %42 = vector.shape_cast %41 : vector<128xf32> to vector<1x128xf32>
    %cst_25 = arith.constant 1.250000e-01 : f32
    %43 = vector.broadcast %cst_25 : f32 to vector<1x128xf32>
    %44 = arith.mulf %39, %43 : vector<1x128xf32>
    %cst_26 = arith.constant 1.250000e-01 : f32
    %45 = vector.broadcast %cst_26 : f32 to vector<1x128xf32>
    %46 = arith.mulf %42, %45 : vector<1x128xf32>
    %47 = arith.mulf %44, %44 : vector<1x128xf32>
    %48 = arith.subf %46, %47 : vector<1x128xf32>
    %cst_27 = arith.constant 0.000000e+00 : f32
    %49 = vector.broadcast %cst_27 : f32 to vector<1x128xf32>
    %50 = arith.maximumf %48, %49 : vector<1x128xf32>
    %cst_28 = arith.constant 9.99999974E-6 : f32
    %51 = vector.broadcast %cst_28 : f32 to vector<1x128xf32>
    %52 = arith.addf %50, %51 : vector<1x128xf32>
    %53 = math.rsqrt %52 : vector<1x128xf32>
    %54 = arith.mulf %36, %53 : vector<1x128xf32>
    %55 = arith.mulf %44, %54 : vector<1x128xf32>
    %56 = arith.subf %37, %55 : vector<1x128xf32>
    %57 = vector.broadcast %54 : vector<1x128xf32> to vector<8x128xf32>
    %58 = arith.mulf %35, %57 : vector<8x128xf32>
    %59 = vector.broadcast %56 : vector<1x128xf32> to vector<8x128xf32>
    %60 = arith.addf %58, %59 : vector<8x128xf32>
    %cst_29 = arith.constant 0.000000e+00 : f32
    %61 = vector.broadcast %cst_29 : f32 to vector<8x128xf32>
    %62 = arith.maximumf %60, %61 : vector<8x128xf32>
    %c0_30 = arith.constant 0 : index
    %c0_31 = arith.constant 0 : index
    %63 = vector.load %arg2[%c0_30, %c0_31] : memref<8x128xf32, #tpu.memory_space<vmem>>, vector<8x128xf32>
    %64 = arith.mulf %62, %63 : vector<8x128xf32>
    %65 = arith.truncf %64 : vector<8x128xf32> to vector<8x128xbf16>
    %c0_32 = arith.constant 0 : index
    %c0_33 = arith.constant 0 : index
    %66 = vector.load %arg9[%c0_32, %c0_33] : memref<128x128xbf16, #tpu.memory_space<vmem>>, vector<128x128xbf16>
    %cst_34 = arith.constant dense<0.000000e+00> : vector<8x128xf32>
    %67 = tpu.matmul %65, %66, %cst_34 {dimension_numbers = #tpu.dot_dimension_numbers<[1], [0], [0], [1], [0, 0, 1, 1], [], []>} : vector<8x128xbf16>, vector<128x128xbf16>, vector<8x128xf32> -> vector<8x128xf32>
    %c0_35 = arith.constant 0 : index
    %c0_36 = arith.constant 0 : index
    %68 = vector.load %arg10[%c0_35, %c0_36] : memref<1x128xf32, #tpu.memory_space<vmem>>, vector<1x128xf32>
    %69 = vector.broadcast %68 : vector<1x128xf32> to vector<8x128xf32>
    %70 = arith.addf %67, %69 : vector<8x128xf32>
    %cst_37 = arith.constant dense<0xFF800000> : vector<8xf32>
    %71 = vector.multi_reduction <maximumf>, %70, %cst_37 [1] : vector<8x128xf32> to vector<8xf32>
    %72 = vector.shape_cast %71 : vector<8xf32> to vector<8x1xf32>
    %73 = vector.broadcast %72 : vector<8x1xf32> to vector<8x128xf32>
    %74 = arith.subf %70, %73 : vector<8x128xf32>
    %75 = math.exp %74 : vector<8x128xf32>
    %cst_38 = arith.constant dense<0.000000e+00> : vector<8xf32>
    %76 = vector.multi_reduction <add>, %75, %cst_38 [1] : vector<8x128xf32> to vector<8xf32>
    %77 = vector.shape_cast %76 : vector<8xf32> to vector<8x1xf32>
    %78 = vector.broadcast %77 : vector<8x1xf32> to vector<8x128xf32>
    %79 = arith.divf %75, %78 : vector<8x128xf32>
    %c0_39 = arith.constant 0 : index
    %c0_40 = arith.constant 0 : index
    %80 = vector.load %arg11[%c0_39, %c0_40] : memref<8x128xf32, #tpu.memory_space<vmem>>, vector<8x128xf32>
    tpu.vector_store %arg11[%c0_39, %c0_40], %79 {strides = array<i32>} : memref<8x128xf32, #tpu.memory_space<vmem>>, vector<8x128xf32>,
    return
  }
}

</mosaic_0001>

<bundles_post_ra>
// kernel: tpu_custom_call.1
= control target key start
LH: loop header
LB: loop body
LE: loop exit
PB: predicated region body
PF: predicated region fallthrough
CT: control target
= control target key end

     0   :  { %16 = vsyncpa [#allocation3], 0  ;;  %s920_s0 = inlined_call_operand.hbm [shape: f32[8,128], index: 0, kind: input, shape index: {}]   ;;  %s921_s1 = inlined_call_operand.hbm [shape: f32[8,128], index: 1, kind: input, shape index: {}]   ;;  %s922_s2 = inlined_call_operand.hbm [shape: f32[8,128], index: 2, kind: input, shape index: {}]   ;;  %s923_s3 = inlined_call_operand.hbm [shape: bf16[128,128], index: 3, kind: input, shape index: {}]   ;;  %s924_s4 = inlined_call_operand.vmem [shape: f32[1,128], index: 4, kind: input, shape index: {}]   ;;  %s925_s5 = inlined_call_operand.vmem [shape: f32[1,128], index: 5, kind: input, shape index: {}]   ;;  %s926_s6 = inlined_call_operand.hbm [shape: bf16[128,128], index: 6, kind: input, shape index: {}]   ;;  %s927_s7 = inlined_call_operand.vmem [shape: f32[1,128], index: 7, kind: input, shape index: {}]   ;;  %s928_s8 = inlined_call_operand.vmem [shape: f32[1,128], index: 8, kind: input, shape index: {}]   ;;  %s929_s9 = inlined_call_operand.hbm [shape: bf16[128,128], index: 9, kind: input, shape index: {}]   ;;  %s930_s10 = inlined_call_operand.vmem [shape: f32[1,128], index: 10, kind: input, shape index: {}]   ;;  %s931_s11 = inlined_call_operand.hbm [shape: f32[8,128], index: 11, kind: output, shape index: {}]  }
   0x1   :  { %17 = vsyncpa [#allocation6], 0 }
   0x2   :  { %18 = vsyncpa [#allocation9], 0 }
   0x3   :  { %19 = vsyncpa [#allocation12], 0  ;;  %s37_s19 = sshll.u32 %s921_s1, 4  ;;  %s38_s19 = int_to_ptr.hbm [resolvable:$true] %s37_s19 }
   0x4   :  { %20 = vsyncpa [#allocation4], 0  ;;  %s815_s20 = smov [#allocation5]   ;;  %s58_s24 = sshll.u32 %s923_s3, 4  ;;  %s59_s24 = int_to_ptr.hbm [resolvable:$true] %s58_s24 }
   0x5   :  { %s39_s21 = sshll.u32 %s815_s20, 4  ;;  %s816_s25 = smov [#allocation8]   ;;  %s40_s21 = int_to_ptr.vmem [resolvable:$true] %s39_s21 }
   0x6   :  { %42 = dma.hbm_to_vmem [thread:$0]  %s38_s19, 128, %s40_s21, [#allocation6]  }
   0x7   :  { %s60_s26 = sshll.u32 %s816_s25, 4  ;;  %s817_s27 = smov 64   ;;  %s61_s26 = int_to_ptr.vmem [resolvable:$true] %s60_s26 }
   0x8   :  { %s818_s28 = smov 4   ;;  %s26_s1 = sshll.u32 %s920_s0, 4  ;;  %s27_s1 = int_to_ptr.hbm [resolvable:$true] %s26_s1 }
   0x9   :  { %66 = dma.hbm_to_vmem [thread:$0]  %s59_s24, 1024, %s61_s26, [#allocation9], %s817_s27, %s817_s27, %s818_s28  }
   0xa   :  { %s819_s12 = smov [#allocation2]   ;;  %s48_s3 = sshll.u32 %s922_s2, 4  ;;  %s49_s3 = int_to_ptr.hbm [resolvable:$true] %s48_s3 }
   0xb   :  { %s28_s13 = sshll.u32 %s819_s12, 4  ;;  %s820_s16 = smov [#allocation7]   ;;  %s29_s13 = int_to_ptr.vmem [resolvable:$true] %s28_s13 }
   0xc   :  { %31 = dma.hbm_to_vmem [thread:$0]  %s27_s1, 128, %s29_s13, [#allocation3]  }
   0xd   :  { %s50_s17 = sshll.u32 %s820_s16, 4  ;;  %s75_s20 = sshll.u32 %s926_s6, 4  ;;  %s51_s17 = int_to_ptr.vmem [resolvable:$true] %s50_s17  ;;  %s76_s20 = int_to_ptr.hbm [resolvable:$true] %s75_s20 }
   0xe   :  { %53 = dma.hbm_to_vmem [thread:$0]  %s49_s3, 128, %s51_s17, [#allocation6]  }
   0xf   :  { %s92_s22 = sshll.u32 %s929_s9, 4  ;;  %s821_s23 = smov [#allocation10]   ;;  %s93_s22 = int_to_ptr.hbm [resolvable:$true] %s92_s22 }
  0x10   :  { %s77_s24 = sshll.u32 %s821_s23, 4  ;;  %s822_s2 = smov [#allocation11]   ;;  %s78_s24 = int_to_ptr.vmem [resolvable:$true] %s77_s24 }
  0x11   :  { %83 = dma.hbm_to_vmem [thread:$0]  %s76_s20, 1024, %s78_s24, [#allocation9], %s817_s27, %s817_s27, %s818_s28  }
  0x12   :  { %s94_s25 = sshll.u32 %s822_s2, 4  ;;  %s95_s25 = int_to_ptr.vmem [resolvable:$true] %s94_s25 }
  0x13   :  { %100 = dma.hbm_to_vmem [thread:$0]  %s93_s22, 1024, %s95_s25, [#allocation12], %s817_s27, %s817_s27, %s818_s28  }
  0x14   :  { %805 = dma.done.wait [#allocation3], 128  }
  0x15   :  { %806 = vsyncadd [#allocation3], 4294967168 }
  0x16   :  { %807 = dma.done.wait [#allocation6], 256  }
  0x17   :  { %808 = vsyncadd [#allocation6], 4294967040 }
  0x18   :  { %809 = dma.done.wait [#allocation9], 2048  }
  0x19   :  { %810 = vsyncadd [#allocation9], 4294965248 }
  0x1a   :  { %811 = dma.done.wait [#allocation12], 1024  }
  0x1b   :  { %812 = vsyncadd [#allocation12], 4294966272  ;;  %v602_v0 = vld [vmem:[#allocation8 + $0x38] sm:$0xff]  ;;  %v601_v1 = vld [vmem:[#allocation8 + $0x30] sm:$0xff]  ;;  %s486_s13 = sshll.u32 %s931_s11, 4  ;;  %s487_s13 = int_to_ptr.hbm [resolvable:$true] %s486_s13 }
  0x1c   :  { %193 = vmatpush.bf16.msra.mxu0 %v602_v0  ;;  %v600_v2 = vld [vmem:[#allocation8 + $0x28] sm:$0xff]  ;;  %v599_v3 = vld [vmem:[#allocation8 + $0x20] sm:$0xff]  ;;  %v598_v4 = vld [vmem:[#allocation8 + $0x18] sm:$0xff] }
  0x1d   :  { %v597_v5 = vld [vmem:[#allocation8 + $0x10] sm:$0xff]  ;;  %v596_v6 = vld [vmem:[#allocation8 + $0x8] sm:$0xff]  ;;  %v595_v7 = vld [vmem:[#allocation8] sm:$0xff] }
  0x1e   :  { %v127_v8 = vld [vmem:[#allocation2] sm:$0xff]  ;;  %v610_v10 = vld [vmem:[#allocation10 + $0x38] sm:$0xff]  ;;  %v609_v11 = vld [vmem:[#allocation10 + $0x30] sm:$0xff] }
  0x1f   :  { %v128_v9 = vpack.c.bf16 %v127_v8, %v127_v8  ;;  %316 = vmatpush.bf16.msra.mxu1 %v610_v10  ;;  %v608_v13 = vld [vmem:[#allocation10 + $0x28] sm:$0xff]  ;;  %v607_v18 = vld [vmem:[#allocation10 + $0x20] sm:$0xff]  ;;  %v606_v24 = vld [vmem:[#allocation10 + $0x18] sm:$0xff] }
  0x20   :  { %194 = vmatpush.bf16.msra.mxu0 %v601_v1  ;;  %v605_v29 = vld [vmem:[#allocation10 + $0x10] sm:$0xff]  ;;  %v604_v32 = vld [vmem:[#allocation10 + $0x8] sm:$0xff]  ;;  %v603_v36 = vld [vmem:[#allocation10] sm:$0xff] }
  0x21   :  { %v206_v44 = vld [vmem:[%s924_s4] sm:$0x1]  ;;  %v249_v55 = vld [vmem:[#allocation5] sm:$0xff]  ;;  %v618_v59 = vld [vmem:[#allocation11 + $0x38] sm:$0xff] }
  0x22   :  { %v207_v48 = vld [vmem:[%s925_s5] sm:$0x1]  ;;  %443 = vmatpush.bf16.msra.mxu2 %v618_v59  ;;  %v617_v60 = vld [vmem:[#allocation11 + $0x30] sm:$0xff] }
  0x23   :  { %317 = vmatpush.bf16.msra.mxu1 %v609_v11  ;;  %v616_v62 = vld [vmem:[#allocation11 + $0x28] sm:$0xff] }
  0x24   :  { %195 = vmatpush.bf16.msra.mxu0 %v600_v2 }
  0x26   :  { %444 = vmatpush.bf16.msra.mxu2 %v617_v60 }
  0x27   :  { %318 = vmatpush.bf16.msra.mxu1 %v608_v13 }
  0x28   :  { %196 = vmatpush.bf16.msra.mxu0 %v599_v3  ;;  %v615_v3 = vld [vmem:[#allocation11 + $0x20] sm:$0xff] }
  0x2a   :  { %445 = vmatpush.bf16.msra.mxu2 %v616_v62 }
  0x2b   :  { %319 = vmatpush.bf16.msra.mxu1 %v607_v18 }
  0x2c   :  { %197 = vmatpush.bf16.msra.mxu0 %v598_v4 }
  0x2e   :  { %446 = vmatpush.bf16.msra.mxu2 %v615_v3 }
  0x2f   :  { %320 = vmatpush.bf16.msra.mxu1 %v606_v24 }
  0x30   :  { %198 = vmatpush.bf16.msra.mxu0 %v597_v5 }
  0x33   :  { %321 = vmatpush.bf16.msra.mxu1 %v605_v29  ;;  %v329_v29 = vld [vmem:[%s927_s7] sm:$0x1] }
  0x34   :  { %199 = vmatpush.bf16.msra.mxu0 %v596_v6 }
  0x37   :  { %322 = vmatpush.bf16.msra.mxu1 %v604_v32 }
  0x38   :  { %200 = vmatpush.bf16.msra.mxu0 %v595_v7 }
  0x3b   :  { %201 = vmatmul.bf16.vlgmr.msra.gmra.mxu0 %v128_v9  ;;  %323 = vmatpush.bf16.msra.mxu1 %v603_v36  ;;  %v614_v9 = vld [vmem:[#allocation11 + $0x18] sm:$0xff] }
  0x3c   :  { %447 = vmatpush.bf16.msra.mxu2 %v614_v9 }
  0xb8   :  { %v202_v12 = vpop.f32.mrf.mxu0 }
  0xb9   :  { %v208_v14 = vrot.slane %v202_v12, 4  ;;  %v214_v15 = vmul.f32 %v202_v12, %v202_v12 }
  0xbb   :  { %v209_v16 = vadd.f32 %v208_v14, %v202_v12  ;;  %v215_v17 = vrot.slane %v214_v15, 4  ;;  %v613_v14 = vld [vmem:[#allocation11 + $0x10] sm:$0xff] }
  0xbc   :  { %448 = vmatpush.bf16.msra.mxu2 %v613_v14 }
  0xbd   :  { %v210_v19 = vrot.slane %v209_v16, 2  ;;  %v216_v20 = vadd.f32 %v215_v17, %v214_v15  ;;  %v612_v17 = vld [vmem:[#allocation11 + $0x8] sm:$0xff] }
  0xbf   :  { %v211_v21 = vadd.f32 %v210_v19, %v209_v16  ;;  %v217_v22 = vrot.slane %v216_v20, 2 }
  0xc0   :  { %v204_v23 = vpop.f32.mrf.mxu0  ;;  %449 = vmatpush.bf16.msra.mxu2 %v612_v17 }
  0xc1   :  { %v212_v25 = vrot.slane %v211_v21, 1  ;;  %v218_v26 = vadd.f32 %v217_v22, %v216_v20 }
  0xc3   :  { %v213_v27 = vadd.f32 %v212_v25, %v211_v21  ;;  %v219_v28 = vrot.slane %v218_v26, 1  ;;  %v611_v21 = vld [vmem:[#allocation11] sm:$0xff] }
  0xc4   :  { %450 = vmatpush.bf16.msra.mxu2 %v611_v21 }
  0xc5   :  { %v220_v30 = vadd.f32 %v219_v28, %v218_v26  ;;  %v221_v31 = vmul.f32 0.125, %v213_v27 }
  0xc7   :  { %v222_v33 = vmul.f32 0.125, %v220_v30  ;;  %v223_v34 = vmul.f32 %v221_v31, %v221_v31 }
  0xc9   :  { %v224_v35 = vsub.f32 %v222_v33, %v223_v34  ;;  %v330_v33 = vld [vmem:[%s928_s8] sm:$0x1]  ;;  %s823_s8 = smov [#allocation13]  }
  0xcb   :  { %v225_v37 = vmax.f32 %v224_v35, 0.0 }
  0xcd   :  { %v226_v38 = vadd.f32 1e-05, %v225_v37 }
  0xcf   :  { %629 = vrsqrt.f32 %v226_v38  ;;  %vm233_vm1 = vweird.f32 %v226_v38 }
  0xd5   :  { %v630_v39 = vpop.eup %629 }
  0xd6   :  { %v228_v40 = vmul.f32 %v630_v39, %v226_v38  ;;  %vm234_vm0 = vweird.f32 %v630_v39 }
  0xd7   :  { %vm235_vm2 = vmor %vm233_vm1, %vm234_vm0 }
  0xd8   :  { %v229_v41 = vmul.f32 %v630_v39, %v228_v40  ;;  %v372_v40 = vld [vmem:[#allocation7] sm:$0xff] }
  0xda   :  { %v230_v42 = vmul.f32 0.5, %v229_v41 }
  0xdc   :  { %v231_v43 = vsub.f32 1.5, %v230_v42 }
  0xde   :  { %v232_v45 = vmul.f32 %v630_v39, %v231_v43 }
  0xe0   :  { %v236_v46 = vsel %vm235_vm2, %v630_v39, %v232_v45 }
  0xe1   :  { %v237_v47 = vmul.f32 %v236_v46, %v206_v44  ;;  %v628_v44 = vld [vmem:[%s930_s10] ss:$0 sm:$0xff]  ;;  %s484_s10 = sshll.u32 %s823_s8, 4  ;;  %s485_s10 = int_to_ptr.vmem [resolvable:$true] %s484_s10 }
  0xe3   :  { %v241_v49 = vperm.slane %v237_v47, 0  ;;  %v238_v50 = vmul.f32 %v237_v47, %v221_v31 }
  0xe5   :  { %v239_v51 = vsub.f32 %v207_v48, %v238_v50  ;;  %v243_v52 = vmul.f32 %v241_v49, %v202_v12 }
  0xe7   :  { %v245_v53 = vperm.slane %v239_v51, 0 }
  0xe9   :  { %v247_v54 = vadd.f32 %v245_v53, %v243_v52 }
  0xeb   :  { %v248_v56 = vmax.f32 %v247_v54, 0.0 }
  0xed   :  { %v250_v57 = vmul.f32 %v249_v55, %v248_v56 }
  0xef   :  { %v251_v58 = vpack.c.bf16 %v250_v57, %v250_v57 }
  0xf1   :  { %324 = vmatmul.bf16.vlgmr.msra.gmra.mxu1 %v251_v58 }
 0x16e   :  { %v325_v61 = vpop.f32.mrf.mxu1 }
 0x16f   :  { %v331_v63 = vrot.slane %v325_v61, 4  ;;  %v337_v0 = vmul.f32 %v325_v61, %v325_v61 }
 0x171   :  { %v332_v1 = vadd.f32 %v331_v63, %v325_v61  ;;  %v338_v2 = vrot.slane %v337_v0, 4 }
 0x173   :  { %v333_v4 = vrot.slane %v332_v1, 2  ;;  %v339_v5 = vadd.f32 %v338_v2, %v337_v0 }
 0x175   :  { %v334_v6 = vadd.f32 %v333_v4, %v332_v1  ;;  %v340_v7 = vrot.slane %v339_v5, 2 }
 0x176   :  { %v327_v8 = vpop.f32.mrf.mxu1 }
 0x177   :  { %v335_v10 = vrot.slane %v334_v6, 1  ;;  %v341_v11 = vadd.f32 %v340_v7, %v339_v5 }
 0x179   :  { %v336_v12 = vadd.f32 %v335_v10, %v334_v6  ;;  %v342_v13 = vrot.slane %v341_v11, 1 }
 0x17b   :  { %v343_v15 = vadd.f32 %v342_v13, %v341_v11  ;;  %v344_v16 = vmul.f32 0.125, %v336_v12 }
 0x17d   :  { %v345_v18 = vmul.f32 0.125, %v343_v15  ;;  %v346_v19 = vmul.f32 %v344_v16, %v344_v16 }
 0x17f   :  { %v347_v20 = vsub.f32 %v345_v18, %v346_v19 }
 0x181   :  { %v348_v22 = vmax.f32 %v347_v20, 0.0 }
 0x183   :  { %v349_v23 = vadd.f32 1e-05, %v348_v22 }
 0x185   :  { %631 = vrsqrt.f32 %v349_v23  ;;  %vm356_vm4 = vweird.f32 %v349_v23 }
 0x18b   :  { %v632_v24 = vpop.eup %631 }
 0x18c   :  { %v351_v25 = vmul.f32 %v632_v24, %v349_v23  ;;  %vm357_vm3 = vweird.f32 %v632_v24 }
 0x18d   :  { %vm358_vm5 = vmor %vm356_vm4, %vm357_vm3 }
 0x18e   :  { %v352_v26 = vmul.f32 %v632_v24, %v351_v25 }
 0x190   :  { %v353_v27 = vmul.f32 0.5, %v352_v26 }
 0x192   :  { %v354_v28 = vsub.f32 1.5, %v353_v27 }
 0x194   :  { %v355_v30 = vmul.f32 %v632_v24, %v354_v28 }
 0x196   :  { %v359_v31 = vsel %vm358_vm5, %v632_v24, %v355_v30 }
 0x197   :  { %v360_v32 = vmul.f32 %v359_v31, %v329_v29 }
 0x199   :  { %v364_v34 = vperm.slane %v360_v32, 0  ;;  %v361_v35 = vmul.f32 %v360_v32, %v344_v16 }
 0x19b   :  { %v362_v36 = vsub.f32 %v330_v33, %v361_v35  ;;  %v366_v37 = vmul.f32 %v364_v34, %v325_v61 }
 0x19d   :  { %v368_v38 = vperm.slane %v362_v36, 0 }
 0x19f   :  { %v370_v39 = vadd.f32 %v368_v38, %v366_v37 }
 0x1a1   :  { %v371_v41 = vmax.f32 %v370_v39, 0.0 }
 0x1a3   :  { %v373_v42 = vmul.f32 %v372_v40, %v371_v41 }
 0x1a5   :  { %v374_v43 = vpack.c.bf16 %v373_v42, %v373_v42 }
 0x1a7   :  { %451 = vmatmul.bf16.vlgmr.msra.gmra.mxu2 %v374_v43 }
 0x22a   :  { %v452_v45 = vpop.f32.mrf.mxu2 }
 0x22b   :  { %v453_v46 = vadd.f32 %v628_v44, %v452_v45 }
 0x22d   :  { %456 = vmax.xlane.f32.xlu0 %v453_v46 }
 0x232   :  { %v454_v47 = vpop.f32.mrf.mxu2 }
 0x2a0   :  { %v457_v48 = vpop.xlane.xlu0 %456 }
 0x2a1   :  { %v458_v49 = vsub.f32 %v453_v46, %v457_v48 }
 0x2a3   :  { %v459_v50 = vmul.f32 1.442695, %v458_v49 }
 0x2a5   :  { %633 = vpow2.f32 %v459_v50 }
 0x2ab   :  { %v634_v51 = vpop.eup %633 }
 0x2ac   :  { %461 = vadd.xlane.f32.xlu0 %v634_v51 }
 0x31f   :  { %v462_v52 = vpop.xlane.xlu0 %461 }
 0x320   :  { %635 = vrcp.f32 %v462_v52  ;;  %v474_v56 = vand.u32 2147483648, %v462_v52  ;;  %v472_v58 = vand.u32 2147483647, %v462_v52  ;;  %vm468_vm7 = vweird.f32 %v462_v52 }
 0x322   :  { %v475_v60 = vor.u32 1.1754944e-38, %v474_v56  ;;  %vm473_vm9 = vcmp.eq.f32.partialorder %v472_v58, 8.507059e+37 }
 0x326   :  { %v636_v53 = vpop.eup %635 }
 0x327   :  { %v464_v54 = vmul.f32 %v636_v53, %v462_v52  ;;  %vm469_vm6 = vweird.f32 %v636_v53 }
 0x328   :  { %vm470_vm8 = vmor %vm468_vm7, %vm469_vm6 }
 0x329   :  { %v465_v55 = vsub.f32 1.0, %v464_v54 }
 0x32b   :  { %v466_v57 = vmul.f32 %v636_v53, %v465_v55 }
 0x32d   :  { %v467_v59 = vadd.f32 %v636_v53, %v466_v57 }
 0x32f   :  { %v471_v61 = vsel %vm470_vm8, %v636_v53, %v467_v59 }
 0x330   :  { %v476_v62 = vsel %vm473_vm9, %v475_v60, %v471_v61 }
 0x331   :  { %v477_v63 = vmul.f32 %v634_v51, %v476_v62 }
 0x333   :  { %478 = vst [vmem:[#allocation13] sm:$0xff] %v477_v63 }
 0x334   :  { %489 = dma.vmem_to_hbm [thread:$0]  %s485_s10, 128, %s487_s13, [#allocation4]  }
 0x335   :  { %813 = dma.done.wait [#allocation4], 128  }
 0x336   :  { %814 = vsyncadd [#allocation4], 4294967168 }
 0x337   :  { %494 = vsyncpa [#allocation3], 1 }
 0x338   :  { %495 = vsyncpa [#allocation6], 1 }
 0x339   :  { %496 = vsyncpa [#allocation9], 1 }
 0x33a   :  { %497 = vsyncpa [#allocation12], 1 }
 0x33b   :  { %498 = vsyncpa [#allocation4], 1 }

</bundles_post_ra>
